<compile_context>
chip_gen: v7x
topology: tpu7x:2x2x1
jax: 0.10.0
libtpu: 0.0.40
codegen_flags: <defaults>
</compile_context>

<pallas_src>
import functools

import numpy as np

import jax
import jax.numpy as jnp
from jax.experimental import pallas as pl
from jax.experimental.pallas import tpu as pltpu


def generate_custom_kernel(kernel_size, attenuation=1.0, scaling_factor=1.0):
    # TODO(synk): the original `generate_custom_kernel` source is not provided;
    # deterministic distance-attenuated stand-in matching the ctor signature.
    c = (kernel_size - 1) / 2.0
    ii, jj = np.meshgrid(
        np.arange(kernel_size, dtype=np.float32),
        np.arange(kernel_size, dtype=np.float32),
        indexing="ij",
    )
    dist = np.sqrt((ii - c) ** 2 + (jj - c) ** 2)
    return jnp.asarray((scaling_factor * np.exp(-attenuation * dist)).astype(np.float32))


# --------------------------------------------------------------------------- #
# Host-side constant tables
# --------------------------------------------------------------------------- #

def _build_conv_matrix_T(kern_np, h, w):
    """A^T for the MXU path: conv_flat = sq_flat @ A^T, with 'same' padding and
    boundary zeros baked into the matrix."""
    k = kern_np.shape[0]
    p = k // 2
    hw = h * w
    A = np.zeros((hw, hw), dtype=np.float32)
    f = np.arange(hw)
    r, c = f // w, f % w
    for di in range(k):
        for dj in range(k):
            wgt = float(kern_np[di, dj])
            if wgt == 0.0:
                continue
            r2, c2 = r + di - p, c + dj - p
            valid = (r2 >= 0) & (r2 < h) & (c2 >= 0) & (c2 < w)
            A[f[valid], r2[valid] * w + c2[valid]] += wgt
    return np.ascontiguousarray(A.T)


def _build_masked_weight_table(kern_np, h, w):
    """(mw, shifts) for the roll path.  Row t of mw is the per-lane weight of
    tap `shifts[t]` (0 where the tap is out of bounds).  Row 0 is the center
    tap.  Point-symmetric kernels keep only the positive half of the offsets
    with doubled weights (valid because the loss reduces to a global sum)."""
    k = kern_np.shape[0]
    p = k // 2
    hw = h * w
    symmetric = bool(np.allclose(kern_np, kern_np[::-1, ::-1]))
    lane = np.arange(hw)
    row, col = lane // w, lane % w

    mw_rows = [np.full(hw, float(kern_np[p, p]), np.float32)]
    shifts = [0]
    for di in range(k):
        for dj in range(k):
            dh, dw = di - p, dj - p
            if (dh, dw) == (0, 0):
                continue
            wgt = float(kern_np[di, dj])
            if symmetric:
                if dh < 0 or (dh == 0 and dw < 0):
                    continue  # folded into the mirror tap
                wgt *= 2.0
            if wgt == 0.0:
                continue
            valid = ((row + dh >= 0) & (row + dh < h) &
                     (col + dw >= 0) & (col + dw < w))
            mw_rows.append(np.where(valid, np.float32(wgt),
                                    np.float32(0.0)).astype(np.float32))
            shifts.append(dh * w + dw)
    return np.stack(mw_rows, axis=0), tuple(shifts)


# --------------------------------------------------------------------------- #
# Kernels
# --------------------------------------------------------------------------- #

def _masked_sq(pred_ref, label_ref, n, bn, ragged):
    """Squared error for one batch tile, with ragged-last-tile rows zeroed."""
    diff = pred_ref[...].astype(jnp.float32) - label_ref[...].astype(jnp.float32)
    sq = diff * diff
    if ragged:
        rid = (jax.lax.broadcasted_iota(jnp.int32, sq.shape, 0)
               + pl.program_id(0) * bn)
        sq = jnp.where(rid < n, sq, 0.0)  # zeroing sq kills all contributions
    return sq


def _conv_mse_mxu_kernel(pred_ref, label_ref, amat_ref, psum_ref, *,
                         n, bn, ragged):
    """conv via one MXU matmul against the resident banded conv matrix A^T."""
    sq = _masked_sq(pred_ref, label_ref, n, bn, ragged)
    conv = jnp.dot(sq, amat_ref[...], preferred_element_type=jnp.float32)
    psum_ref[0] = jnp.sum(conv * sq, axis=0, keepdims=True)


def _conv_mse_roll_kernel(pred_ref, label_ref, mw_ref, psum_ref, *,
                          shifts, hw, n, bn, ragged):
    """conv via lane rolls (XLU) * precomputed masked weights (no in-kernel
    iota/mask construction)."""
    sq = _masked_sq(pred_ref, label_ref, n, bn, ragged)
    conv = sq * mw_ref[0]                       # center tap (d == 0)
    for t in range(1, len(shifts)):
        d = shifts[t]
        conv = conv + pltpu.roll(sq, shift=(-d) % hw, axis=1) * mw_ref[t]
    psum_ref[0] = jnp.sum(conv * sq, axis=0, keepdims=True)


# --------------------------------------------------------------------------- #
# Wrapper
# --------------------------------------------------------------------------- #

def _pick_batch_tile(n, hw, itemsize, max_block_bytes, min_grid=4):
    """Images per grid step: honor the per-buffer byte budget, but cap so large
    batches get at least `min_grid` grid steps (megacore + pipelining)."""
    if n <= 8:
        return n
    row_bytes = max(1, hw * itemsize)
    cap_bytes = max(8, (max_block_bytes // row_bytes) // 8 * 8)
    cap_grid = max(8, (-(-n // min_grid) + 7) // 8 * 8)
    return min(cap_bytes, cap_grid, n)


def make_conv_mse_loss(kernel2d, *, max_block_bytes=2 << 20,
                       mxu_amat_bytes=4 << 20, min_grid=4):
    """Build a jitted loss(prediction, label) for (N, H, W) inputs.

    The conv filter is a fixed, non-trainable parameter (as in the PyTorch
    module); its weights are baked into compile-time constant tables.
    """
    kern_np = np.asarray(jax.device_get(kernel2d), dtype=np.float32)
    k = kern_np.shape[0]
    assert kern_np.shape == (k, k), "conv kernel must be square"
    assert k % 2 == 1, "F.conv2d(padding=k//2) 'same' semantics require odd k"

    def loss_fn(prediction, label):
        n, h, w = prediction.shape
        assert label.shape == prediction.shape
        assert k // 2 < h and k // 2 < w, "kernel larger than image unsupported"
        hw = h * w
        itemsize = jnp.dtype(prediction.dtype).itemsize

        bn = _pick_batch_tile(n, hw, itemsize, max_block_bytes, min_grid)
        num_tiles = -(-n // bn)
        ragged = (n % bn) != 0

        # Lane-dense layout: flatten each image row-major into the lane axis.
        pred2 = prediction.reshape(n, hw)
        lab2 = label.reshape(n, hw)

        use_mxu = hw * hw * 4 <= mxu_amat_bytes
        if use_mxu:
            table_np = _build_conv_matrix_T(kern_np, h, w)
            kernel_fn = functools.partial(
                _conv_mse_mxu_kernel, n=n, bn=bn, ragged=ragged)
        else:
            # TODO(synk): images whose (bn, hw) tile exceeds the VMEM budget
            # would additionally need spatial tiling with a k//2 halo.
            table_np, shifts = _build_masked_weight_table(kern_np, h, w)
            kernel_fn = functools.partial(
                _conv_mse_roll_kernel, shifts=shifts, hw=hw,
                n=n, bn=bn, ragged=ragged)
        table = jnp.asarray(table_np)
        table_spec = pl.BlockSpec(table_np.shape, lambda i: (0,) * table_np.ndim)

        # Explicit VMEM budget: 2 inputs x 2 pipeline buffers + resident table
        # + f32 temporaries, capped for v7x's 64 MiB physical VMEM.
        block_in = bn * hw * itemsize
        est = (4 * block_in + 2 * table_np.nbytes
               + 8 * bn * hw * 4 + 4 * hw * 4 + (2 << 20))
        vmem_limit = int(min(64 << 20, max(32 << 20, est)))

        psums = pl.pallas_call(
            kernel_fn,
            out_shape=jax.ShapeDtypeStruct((num_tiles, 1, hw), jnp.float32),
            grid_spec=pltpu.PrefetchScalarGridSpec(
                num_scalar_prefetch=0,
                grid=(num_tiles,),
                in_specs=[
                    pl.BlockSpec((bn, hw), lambda i: (i, 0)),
                    pl.BlockSpec((bn, hw), lambda i: (i, 0)),
                    table_spec,
                ],
                out_specs=pl.BlockSpec((1, 1, hw), lambda i: (i, 0, 0)),
            ),
            compiler_params=pltpu.CompilerParams(
                dimension_semantics=("parallel",),
                vmem_limit_bytes=vmem_limit),
        )(pred2, lab2, table)

        # Single finalize: sum of per-tile lane-dense partials + one normalize.
        return jnp.sum(psums) * np.float32(1.0 / (n * h * w))

    return jax.jit(loss_fn)


# --------------------------------------------------------------------------- #
# Reference + tests
# --------------------------------------------------------------------------- #

def _reference_loss(prediction, label, kernel2d):
    """Pure-JAX replica of the PyTorch forward (NCHW conv2d)."""
    k = kernel2d.shape[0]
    p = k // 2
    sq = (prediction.astype(jnp.float32) - label.astype(jnp.float32)) ** 2
    sq4 = sq[:, None, :, :]
    k4 = kernel2d.astype(jnp.float32)[None, None, :, :]
    conv = jax.lax.conv_general_dilated(
        sq4, k4, window_strides=(1, 1), padding=[(p, p), (p, p)],
        dimension_numbers=("NCHW", "OIHW", "NCHW"),
        precision=jax.lax.Precision.HIGHEST)
    return jnp.mean(conv * sq4)


if __name__ == "__main__":
    key = jax.random.PRNGKey(0)
    k1, k2, k3, k4 = jax.random.split(key, 4)

    # Case 1: module defaults (kernel_size=3), small (N, H, W) input -> MXU path.
    kernel3 = generate_custom_kernel(3, 1.0, 1.0)
    loss3 = make_conv_mse_loss(kernel3)
    pred = jax.random.normal(k1, (2, 16, 16), dtype=jnp.float32)
    lab = jax.random.normal(k2, (2, 16, 16), dtype=jnp.float32)
    out = jax.block_until_ready(loss3(pred, lab))
    ref = jax.block_until_ready(_reference_loss(pred, lab, kernel3))
    assert jnp.allclose(out, ref, rtol=5e-3, atol=1e-5), (out, ref)

    # Case 2: k=5, roll path forced, tiny block budget -> multi-tile grid with a
    # ragged (in-kernel masked) last tile, symmetric half-tap folding.
    kernel5 = generate_custom_kernel(5, 0.7, 1.3)
    loss5 = make_conv_mse_loss(kernel5, max_block_bytes=8 * 1024, mxu_amat_bytes=0)
    pred2 = jax.random.normal(k3, (20, 16, 16), dtype=jnp.float32)
    lab2 = jax.random.normal(k4, (20, 16, 16), dtype=jnp.float32)
    out2 = jax.block_until_ready(loss5(pred2, lab2))
    ref2 = jax.block_until_ready(_reference_loss(pred2, lab2, kernel5))
    assert jnp.allclose(out2, ref2, rtol=1e-4, atol=1e-6), (out2, ref2)

    # Case 3: bf16 inputs streamed without a wrapper-side f32 cast (MXU path).
    pred_bf = pred.astype(jnp.bfloat16)
    lab_bf = lab.astype(jnp.bfloat16)
    out3 = jax.block_until_ready(loss3(pred_bf, lab_bf))
    ref3 = jax.block_until_ready(_reference_loss(pred_bf, lab_bf, kernel3))
    assert jnp.allclose(out3, ref3, rtol=5e-3, atol=1e-5), (out3, ref3)

    # Case 4: asymmetric kernel on the roll path (full tap loop, no symmetry
    # folding) with a non-128-aligned lane extent (8x8 images).
    kern_asym = jnp.asarray(
        (np.arange(9, dtype=np.float32).reshape(3, 3) / 10.0 + 0.1))
    loss_a = make_conv_mse_loss(kern_asym, mxu_amat_bytes=0)
    k5, k6 = jax.random.split(k3)
    pred4 = jax.random.normal(k5, (4, 8, 8), dtype=jnp.float32)
    lab4 = jax.random.normal(k6, (4, 8, 8), dtype=jnp.float32)
    out4 = jax.block_until_ready(loss_a(pred4, lab4))
    ref4 = jax.block_until_ready(_reference_loss(pred4, lab4, kern_asym))
    assert jnp.allclose(out4, ref4, rtol=1e-4, atol=1e-6), (out4, ref4)

    print("KERNEL_OK")
</pallas_src>

<mosaic_0001>
module attributes {stable_mosaic.version = 11 : i64} {
  func.func @_conv_mse_mxu_kernel(%arg0: i32, %arg1: memref<2x256xf32, #tpu.memory_space<vmem>>, %arg2: memref<2x256xf32, #tpu.memory_space<vmem>>, %arg3: memref<256x256xf32, #tpu.memory_space<vmem>>, %arg4: memref<1x1x256xf32, #tpu.memory_space<vmem>>) attributes {dimension_semantics = [#tpu.dimension_semantics<parallel>], iteration_bounds = array<i64: 1>, scalar_prefetch = 0 : i64, scratch_operands = 0 : i64, tpu.core_type = #tpu.core_type<tc>, window_params = [{transform_indices = @transform_0, window_bounds = array<i64: 2, 256>}, {transform_indices = @transform_1, window_bounds = array<i64: 2, 256>}, {pipeline_mode = #tpu.pipeline_mode<synchronous>, transform_indices = @transform_2, window_bounds = array<i64: 256, 256>}, {transform_indices = @transform_3, window_bounds = array<i64: 1, 1, 256>}]} {
    %c0 = arith.constant 0 : index
    %c0_0 = arith.constant 0 : index
    %0 = vector.load %arg1[%c0, %c0_0] : memref<2x256xf32, #tpu.memory_space<vmem>>, vector<2x256xf32>
    %c0_1 = arith.constant 0 : index
    %c0_2 = arith.constant 0 : index
    %1 = vector.load %arg2[%c0_1, %c0_2] : memref<2x256xf32, #tpu.memory_space<vmem>>, vector<2x256xf32>
    %2 = arith.subf %0, %1 : vector<2x256xf32>
    %3 = arith.mulf %2, %2 : vector<2x256xf32>
    %c0_3 = arith.constant 0 : index
    %c0_4 = arith.constant 0 : index
    %4 = vector.load %arg3[%c0_3, %c0_4] : memref<256x256xf32, #tpu.memory_space<vmem>>, vector<256x256xf32>
    %cst = arith.constant dense<0.000000e+00> : vector<2x256xf32>
    %5 = tpu.matmul %3, %4, %cst {dimension_numbers = #tpu.dot_dimension_numbers<[1], [0], [0], [1], [0, 0, 1, 1], [], []>} : vector<2x256xf32>, vector<256x256xf32>, vector<2x256xf32> -> vector<2x256xf32>
    %6 = arith.mulf %5, %3 : vector<2x256xf32>
    %cst_5 = arith.constant dense<0.000000e+00> : vector<256xf32>
    %7 = vector.multi_reduction <add>, %6, %cst_5 [0] : vector<2x256xf32> to vector<256xf32>
    %8 = vector.shape_cast %7 : vector<256xf32> to vector<1x256xf32>
    %c0_6 = arith.constant 0 : index
    %c0_7 = arith.constant 0 : index
    %c0_8 = arith.constant 0 : index
    %9 = vector.load %arg4[%c0_6, %c0_7, %c0_8] : memref<1x1x256xf32, #tpu.memory_space<vmem>>, vector<1x1x256xf32>
    %10 = vector.shape_cast %9 : vector<1x1x256xf32> to vector<1x256xf32>
    %11 = vector.shape_cast %8 : vector<1x256xf32> to vector<1x1x256xf32>
    tpu.vector_store %arg4[%c0_6, %c0_7, %c0_8], %11 {strides = array<i32>} : memref<1x1x256xf32, #tpu.memory_space<vmem>>, vector<1x1x256xf32>,
    return
  }
  func.func @transform_0(%arg0: i32) -> (i32, i32) {
    %c0_i32 = arith.constant 0 : i32
    %c0_i32_0 = arith.constant 0 : i32
    return %arg0, %c0_i32 : i32, i32
  }
  func.func @transform_1(%arg0: i32) -> (i32, i32) {
    %c0_i32 = arith.constant 0 : i32
    %c0_i32_0 = arith.constant 0 : i32
    return %arg0, %c0_i32 : i32, i32
  }
  func.func @transform_2(%arg0: i32) -> (i32, i32) {
    %c0_i32 = arith.constant 0 : i32
    %c0_i32_0 = arith.constant 0 : i32
    %c0_i32_1 = arith.constant 0 : i32
    return %c0_i32, %c0_i32_0 : i32, i32
  }
  func.func @transform_3(%arg0: i32) -> (i32, i32, i32) {
    %c0_i32 = arith.constant 0 : i32
    %c0_i32_0 = arith.constant 0 : i32
    %c0_i32_1 = arith.constant 0 : i32
    return %arg0, %c0_i32, %c0_i32_0 : i32, i32, i32
  }
}

</mosaic_0001>

<bundles_post_ra>
// kernel: loss_fn.1
= control target key start
LH: loop header
LB: loop body
LE: loop exit
PB: predicated region body
PF: predicated region fallthrough
CT: control target
= control target key end

     0   :  { %8 = vsyncpa [#allocation3], 0  ;;  %s316_s12 = smov [#allocation2]   ;;  %s378_s0 = inlined_call_operand.vmem [shape: f32[2,256], index: 0, kind: input, shape index: {}]   ;;  %s379_s1 = inlined_call_operand.vmem [shape: f32[2,256], index: 1, kind: input, shape index: {}]   ;;  %s380_s2 = inlined_call_operand.hbm [shape: f32[256,256], index: 2, kind: input, shape index: {}]   ;;  %s381_s3 = inlined_call_operand.vmem [shape: f32[1,1,256], index: 3, kind: output, shape index: {}]  }
   0x1   :  { %s18_s13 = sshll.u32 %s316_s12, 4  ;;  %s292_s16 = scalar_lea.hbm %s380_s2, 8192  ;;  %s19_s13 = int_to_ptr.vmem [resolvable:$true] %s18_s13 }
   0x2   :  { %p293_p0 = scmp.ne.s32.totalorder %s380_s2, %s292_s16  ;;  %p296_p1 = scmp.lt.u32.totalorder %s292_s16, %s380_s2 }
   0x4   :  { %p298_p2 = pnand %p296_p1, %p293_p0 }
   0x6   :  { %301 = shalt.err (!%p298_p2)
}
   0x7   :  { %s302_s21 = scalar_lea.vmem %s19_s13, 8192  ;;  %p307_p4 = scmp.lt.s32.totalorder %s19_s13, %s19_s13 }
   0x8   :  { %p303_p3 = scmp.ne.s32.totalorder %s19_s13, %s302_s21  ;;  %p308_p5 = scmp.lt.s32.totalorder %s302_s21, %s302_s21 }
   0xa   :  { %p309_p6 = por %p308_p5, %p307_p4 }
   0xc   :  { %p310_p7 = pnand %p309_p6, %p303_p3 }
   0xe   :  { %313 = shalt.err (!%p310_p7)
}
   0xf   :  { %s317_s22 = smov 256   ;;  %s318_s23 = smov 16  }
  0x10   :  { %24 = dma.hbm_to_vmem [thread:$0]  %s380_s2, 8192, %s19_s13, [#allocation3], %s317_s22, %s317_s22, %s318_s23  }
  0x11   :  { %314 = dma.done.wait [#allocation3], 8192  }
  0x12   :  { %315 = vsyncadd [#allocation3], 4294959104  ;;  %v33_v0 = vld [vmem:[#allocation2 + $0x8] sm:$0xff]  ;;  %v35_v1 = vld [vmem:[#allocation2 + $0x18] sm:$0xff]  ;;  %v319_v31 = vmov 1983009808   ;;  %v100_v33 = vlaneseq }
  0x13   :  { %v32_v2 = vld [vmem:[#allocation2] sm:$0xff]  ;;  %v223_v3 = vpack.c.bf16 %v35_v1, %v33_v0  ;;  %v34_v4 = vld [vmem:[#allocation2 + $0x10] sm:$0xff]  ;;  %v37_v5 = vld [vmem:[#allocation2 + $0x28] sm:$0xff]  ;;  %v98_v32 = vunpack.c.l.s4 %v319_v31  ;;  %vm180_vm0 = vcmask 1041408  }
  0x14   :  { %v39_v6 = vld [vmem:[#allocation2 + $0x38] sm:$0xff]  ;;  %v225_v7 = vpack.c.bf16 %v34_v4, %v32_v2  ;;  %v36_v9 = vld [vmem:[#allocation2 + $0x20] sm:$0xff]  ;;  %v38_v10 = vld [vmem:[#allocation2 + $0x30] sm:$0xff]  ;;  %v354_v41 = vshrl.u32 %v100_v33, 7  ;;  %vm215_vm1 = vcmp.lt.s32.totalorder %v100_v33, 256 }
  0x15   :  { %v227_v8 = vpack.c.bf16 %v39_v6, %v37_v5  ;;  %v41_v11 = vld [vmem:[#allocation2 + $0x48] sm:$0xff]  ;;  %224 = vmatprep.subr.bf16.mxu0 %v223_v3  ;;  %v43_v12 = vld [vmem:[#allocation2 + $0x58] sm:$0xff]  ;;  %v229_v13 = vpack.c.bf16 %v38_v10, %v36_v9  ;;  %v40_v15 = vld [vmem:[#allocation2 + $0x40] sm:$0xff]  ;;  %v99_v40 = vunpack.c.0.s8 %v98_v32 }
  0x16   :  { %226 = vmatpush1.bf16.msra.mxu0 %v225_v7  ;;  %v231_v14 = vpack.c.bf16 %v43_v12, %v41_v11  ;;  %v42_v16 = vld [vmem:[#allocation2 + $0x50] sm:$0xff]  ;;  %v45_v17 = vld [vmem:[#allocation2 + $0x68] sm:$0xff]  ;;  %v47_v18 = vld [vmem:[#allocation2 + $0x78] sm:$0xff] }
  0x17   :  { %228 = vmatprep.subr.bf16.mxu0 %v227_v8  ;;  %v233_v19 = vpack.c.bf16 %v42_v16, %v40_v15  ;;  %v235_v20 = vpack.c.bf16 %v47_v18, %v45_v17  ;;  %v44_v21 = vld [vmem:[#allocation2 + $0x60] sm:$0xff]  ;;  %v46_v22 = vld [vmem:[#allocation2 + $0x70] sm:$0xff]  ;;  %v49_v23 = vld [vmem:[#allocation2 + $0x88] sm:$0xff]  ;;  %v102_v51 = vsub.s32 %v99_v40, %v354_v41 }
  0x18   :  { %v51_v24 = vld [vmem:[#allocation2 + $0x98] sm:$0xff]  ;;  %v237_v25 = vpack.c.bf16 %v46_v22, %v44_v21  ;;  %v48_v27 = vld [vmem:[#allocation2 + $0x80] sm:$0xff]  ;;  %v50_v28 = vld [vmem:[#allocation2 + $0x90] sm:$0xff] }
  0x19   :  { %v239_v26 = vpack.c.bf16 %v51_v24, %v49_v23  ;;  %v53_v29 = vld [vmem:[#allocation2 + $0xa8] sm:$0xff]  ;;  %v55_v30 = vld [vmem:[#allocation2 + $0xb8] sm:$0xff]  ;;  %v241_v34 = vpack.c.bf16 %v50_v28, %v48_v27  ;;  %v52_v36 = vld [vmem:[#allocation2 + $0xa0] sm:$0xff] }
  0x1a   :  { %230 = vmatpush1.bf16.msra.mxu0 %v229_v13  ;;  %v243_v35 = vpack.c.bf16 %v55_v30, %v53_v29  ;;  %v54_v37 = vld [vmem:[#allocation2 + $0xb0] sm:$0xff]  ;;  %v57_v38 = vld [vmem:[#allocation2 + $0xc8] sm:$0xff]  ;;  %v59_v39 = vld [vmem:[#allocation2 + $0xd8] sm:$0xff] }
  0x1b   :  { %232 = vmatprep.subr.bf16.mxu0 %v231_v14  ;;  %v245_v42 = vpack.c.bf16 %v54_v37, %v52_v36  ;;  %v56_v43 = vld [vmem:[#allocation2 + $0xc0] sm:$0xff]  ;;  %v247_v44 = vpack.c.bf16 %v59_v39, %v57_v38  ;;  %v58_v45 = vld [vmem:[#allocation2 + $0xd0] sm:$0xff]  ;;  %v61_v48 = vld [vmem:[#allocation2 + $0xe8] sm:$0xff] }
  0x1c   :  { %v28_v46 = vld [vmem:[%s378_s0] sm:$0xf]  ;;  %v63_v49 = vld [vmem:[#allocation2 + $0xf8] sm:$0xff]  ;;  %v249_v52 = vpack.c.bf16 %v58_v45, %v56_v43  ;;  %v62_v56 = vld [vmem:[#allocation2 + $0xf0] sm:$0xff] }
  0x1d   :  { %v29_v47 = vld [vmem:[%s379_s1] sm:$0xf]  ;;  %v251_v54 = vpack.c.bf16 %v63_v49, %v61_v48  ;;  %v65_v57 = vld [vmem:[#allocation2 + $0x108] sm:$0xff]  ;;  %v67_v58 = vld [vmem:[#allocation2 + $0x118] sm:$0xff] }
  0x1e   :  { %234 = vmatpush1.bf16.msra.mxu0 %v233_v19  ;;  %v30_v50 = vsub.f32 %v28_v46, %v29_v47  ;;  %v60_v55 = vld [vmem:[#allocation2 + $0xe0] sm:$0xff]  ;;  %v255_v62 = vpack.c.bf16 %v67_v58, %v65_v57  ;;  %v66_v0 = vld [vmem:[#allocation2 + $0x110] sm:$0xff]  ;;  %v69_v1 = vld [vmem:[#allocation2 + $0x128] sm:$0xff] }
  0x1f   :  { %236 = vmatprep.subr.bf16.mxu0 %v235_v20  ;;  %v253_v60 = vpack.c.bf16 %v62_v56, %v60_v55  ;;  %v64_v63 = vld [vmem:[#allocation2 + $0x100] sm:$0xff]  ;;  %v71_v2 = vld [vmem:[#allocation2 + $0x138] sm:$0xff]  ;;  %v70_v6 = vld [vmem:[#allocation2 + $0x130] sm:$0xff]  ;;  %v320_v55 = vmov 1966171168  }
  0x20   :  { %v31_v53 = vmul.f32 %v30_v50, %v30_v50  ;;  %v257_v3 = vpack.c.bf16 %v66_v0, %v64_v63  ;;  %v259_v4 = vpack.c.bf16 %v71_v2, %v69_v1  ;;  %v68_v5 = vld [vmem:[#allocation2 + $0x120] sm:$0xff]  ;;  %v73_v7 = vld [vmem:[#allocation2 + $0x148] sm:$0xff]  ;;  %v75_v8 = vld [vmem:[#allocation2 + $0x158] sm:$0xff]  ;;  %v199_v56 = vunpack.c.l.s4 %v320_v55 }
  0x21   :  { %v261_v9 = vpack.c.bf16 %v70_v6, %v68_v5  ;;  %v263_v10 = vpack.c.bf16 %v75_v8, %v73_v7  ;;  %v72_v11 = vld [vmem:[#allocation2 + $0x140] sm:$0xff]  ;;  %v74_v12 = vld [vmem:[#allocation2 + $0x150] sm:$0xff]  ;;  %v77_v13 = vld [vmem:[#allocation2 + $0x168] sm:$0xff] }
  0x22   :  { %238 = vmatpush1.bf16.msra.mxu0 %v237_v25  ;;  %v363_v59 = vrot.slane %v31_v53, %v102_v51  ;;  %v79_v14 = vld [vmem:[#allocation2 + $0x178] sm:$0xff]  ;;  %v265_v15 = vpack.c.bf16 %v74_v12, %v72_v11  ;;  %v76_v17 = vld [vmem:[#allocation2 + $0x160] sm:$0xff]  ;;  %v78_v18 = vld [vmem:[#allocation2 + $0x170] sm:$0xff]  ;;  %v200_v63 = vunpack.c.0.s8 %v199_v56 }
  0x23   :  { %240 = vmatprep.subr.bf16.mxu0 %v239_v26  ;;  %v267_v16 = vpack.c.bf16 %v79_v14, %v77_v13  ;;  %v81_v19 = vld [vmem:[#allocation2 + $0x188] sm:$0xff]  ;;  %v83_v20 = vld [vmem:[#allocation2 + $0x198] sm:$0xff]  ;;  %v269_v21 = vpack.c.bf16 %v78_v18, %v76_v17  ;;  %v80_v23 = vld [vmem:[#allocation2 + $0x180] sm:$0xff] }
  0x24   :  { %v367_v61 = vcombine.high %v363_v59, %v363_v59  ;;  %v271_v22 = vpack.c.bf16 %v83_v20, %v81_v19  ;;  %v82_v24 = vld [vmem:[#allocation2 + $0x190] sm:$0xff]  ;;  %v85_v25 = vld [vmem:[#allocation2 + $0x1a8] sm:$0xff]  ;;  %v87_v26 = vld [vmem:[#allocation2 + $0x1b8] sm:$0xff] }
  0x25   :  { %v273_v27 = vpack.c.bf16 %v82_v24, %v80_v23  ;;  %v275_v28 = vpack.c.bf16 %v87_v26, %v85_v25  ;;  %v84_v29 = vld [vmem:[#allocation2 + $0x1a0] sm:$0xff]  ;;  %v86_v30 = vld [vmem:[#allocation2 + $0x1b0] sm:$0xff]  ;;  %v89_v31 = vld [vmem:[#allocation2 + $0x1c8] sm:$0xff] }
  0x26   :  { %242 = vmatpush1.bf16.msra.mxu0 %v241_v34  ;;  %171 = vmatprep.mubr.f32.mxu0 %v367_v61  ;;  %v91_v32 = vld [vmem:[#allocation2 + $0x1d8] sm:$0xff]  ;;  %v277_v34 = vpack.c.bf16 %v86_v30, %v84_v29  ;;  %v88_v36 = vld [vmem:[#allocation2 + $0x1c0] sm:$0xff]  ;;  %v90_v37 = vld [vmem:[#allocation2 + $0x1d0] sm:$0xff] }
  0x27   :  { %244 = vmatprep.subr.bf16.mxu0 %v243_v35  ;;  %v279_v35 = vpack.c.bf16 %v91_v32, %v89_v31  ;;  %v93_v38 = vld [vmem:[#allocation2 + $0x1e8] sm:$0xff]  ;;  %v95_v39 = vld [vmem:[#allocation2 + $0x1f8] sm:$0xff]  ;;  %v281_v40 = vpack.c.bf16 %v90_v37, %v88_v36  ;;  %v92_v43 = vld [vmem:[#allocation2 + $0x1e0] sm:$0xff] }
  0x2a   :  { %246 = vmatpush1.bf16.msra.mxu0 %v245_v42  ;;  %v283_v42 = vpack.c.bf16 %v95_v39, %v93_v38 }
  0x2b   :  { %248 = vmatprep.subr.bf16.mxu0 %v247_v44  ;;  %v94_v44 = vld [vmem:[#allocation2 + $0x1f0] sm:$0xff] }
  0x2c   :  { %v285_v45 = vpack.c.bf16 %v94_v44, %v92_v43 }
  0x2e   :  { %250 = vmatpush1.bf16.msra.mxu0 %v249_v52 }
  0x2f   :  { %252 = vmatprep.subr.bf16.mxu0 %v251_v54 }
  0x32   :  { %254 = vmatpush1.bf16.msra.mxu0 %v253_v60 }
  0x33   :  { %256 = vmatprep.subr.bf16.mxu0 %v255_v62 }
  0x36   :  { %258 = vmatpush1.bf16.msra.mxu0 %v257_v3 }
  0x37   :  { %260 = vmatprep.subr.bf16.mxu0 %v259_v4 }
  0x3a   :  { %262 = vmatpush1.bf16.msra.mxu0 %v261_v9 }
  0x3b   :  { %264 = vmatprep.subr.bf16.mxu0 %v263_v10 }
  0x3e   :  { %266 = vmatpush1.bf16.msra.mxu0 %v265_v15 }
  0x3f   :  { %268 = vmatprep.subr.bf16.mxu0 %v267_v16 }
  0x42   :  { %270 = vmatpush1.bf16.msra.mxu0 %v269_v21 }
  0x43   :  { %272 = vmatprep.subr.bf16.mxu0 %v271_v22 }
  0x46   :  { %274 = vmatpush1.bf16.msra.mxu0 %v273_v27 }
  0x47   :  { %276 = vmatprep.subr.bf16.mxu0 %v275_v28 }
  0x4a   :  { %278 = vmatpush1.bf16.msra.mxu0 %v277_v34 }
  0x4b   :  { %280 = vmatprep.subr.bf16.mxu0 %v279_v35 }
  0x4e   :  { %282 = vmatpush1.bf16.msra.mxu0 %v281_v40 }
  0x4f   :  { %284 = vmatprep.subr.bf16.mxu0 %v283_v42 }
  0x52   :  { %286 = vmatpush1.bf16.msra.mxu0 %v285_v45 }
  0x55   :  { %172 = vmatmul.mubr.f32.vlgmr.msra.gmra.mrb[0].mxu0 %v363_v59 }
 0x128   :  { %v173_v46 = vpop.f32.mrb[0].mxu0 }
 0x129   :  { %v178_v47 = vmul.f32 %v173_v46, %v363_v59  ;;  %v175_v48 = vpop.f32.mrb[1].mxu0  ;;  %v203_v59 = vsub.s32 %v200_v63, %v354_v41 }
 0x12a   :  { %v179_v49 = vmul.f32 %v175_v48, %v367_v61 }
 0x12b   :  { %v181_v50 = vsel %vm180_vm0, %v178_v47, 0.0 }
 0x12c   :  { %v182_v51 = vrot.slane %v181_v50, 4  ;;  %v188_v52 = vsel %vm180_vm0, %v179_v49, 0.0 }
 0x12d   :  { %v189_v53 = vrot.slane %v188_v52, 4 }
 0x12e   :  { %v183_v54 = vadd.f32 %v182_v51, %v181_v50 }
 0x12f   :  { %v190_v57 = vadd.f32 %v189_v53, %v188_v52 }
 0x130   :  { %v184_v58 = vrot.slane %v183_v54, 2 }
 0x131   :  { %v191_v60 = vrot.slane %v190_v57, 2 }
 0x132   :  { %v185_v62 = vadd.f32 %v184_v58, %v183_v54 }
 0x133   :  { %v192_v0 = vadd.f32 %v191_v60, %v190_v57 }
 0x134   :  { %v186_v1 = vrot.slane %v185_v62, 1 }
 0x135   :  { %v193_v2 = vrot.slane %v192_v0, 1 }
 0x136   :  { %v187_v3 = vadd.f32 %v186_v1, %v185_v62 }
 0x137   :  { %v194_v4 = vadd.f32 %v193_v2, %v192_v0 }
 0x139   :  { %v197_v61 = vcombine.low %v187_v3, %v194_v4 }
 0x13b   :  { %v204_v5 = vrot.slane %v197_v61, %v203_v59 }
 0x13d   :  { %v211_v6 = vrot.slane %v204_v5, %v203_v59 }
 0x13f   :  { %217 = vst.msk [vmem:[%s381_s3] sm:$0x3] %vm215_vm1, %v211_v6 }
 0x140   :  { %222 = vsyncpa [#allocation3], 1 }

</bundles_post_ra>
